<compile_context>
chip_gen: v5e
topology: v5e:2x2
jax: 0.10.0
libtpu: 0.0.40
codegen_flags: <defaults>
</compile_context>

<pallas_src>
import numpy as np
import jax
import jax.numpy as jnp
from jax.experimental import pallas as pl
from jax.experimental.pallas import tpu as pltpu

F1, D, F2 = 8, 2, 16          # as in the PyTorch module
IN_CHANS = 26                 # self.in_chans

# Packed parameter-slab column layout (16 rows = F2 output channels).
_P_WDW = slice(0, 26)         # depthwise spatial weights (16, 26)
_P_CM, _P_C0, _P_CP = 26, 27, 28   # fused temporal stencil coeffs (s1*s2*w1)
_P_CB = 29                    # fused bias: s2*b1*rowsum(wdw) + b2
_P_W3M, _P_W30, _P_W3P = 30, 31, 32
_P_B3 = 33                    # BN3 shift
_P_W4 = slice(34, 50)         # pointwise weights with BN3 scale folded (16,16)
_P_BL = 50                    # classifier bias (stored in row 0)
_P_COLS = 51


# --------------------------------------------------------------------------
# Pallas kernel: fused EEGNet_fNIRS forward for one batch block (BB elements).
# Lane layout inside the block: lane i = local_batch * T + t.
# --------------------------------------------------------------------------
def _eegnet_kernel(x_ref, p_ref, aux_ref, seg_ref, pool_ref, prob_ref):
    x = x_ref[0]                                 # (26, NB)  f32
    P = p_ref[...]                               # (16, 51)

    wdw = P[:, _P_WDW]                           # (16, 26)
    c_m = P[:, _P_CM:_P_CM + 1]
    c_0 = P[:, _P_C0:_P_C0 + 1]
    c_p = P[:, _P_CP:_P_CP + 1]
    c_b = P[:, _P_CB:_P_CB + 1]
    w3m = P[:, _P_W3M:_P_W3M + 1]
    w30 = P[:, _P_W30:_P_W30 + 1]
    w3p = P[:, _P_W3P:_P_W3P + 1]
    b3 = P[:, _P_B3:_P_B3 + 1]
    w4 = P[:, _P_W4]                             # (16, 16)  BN3 scale folded
    bl = P[0:1, _P_BL:_P_BL + 1]                 # (1, 1)

    wl_eff = aux_ref[0:F2, :]                    # (16, NB) pool+Linear folded
    mask_m = aux_ref[F2:F2 + 1, :]               # (1, NB) 0 at segment starts
    mask_p = aux_ref[F2 + 1:F2 + 2, :]           # (1, NB) 0 at segment ends

    # block1 temporal conv + BN1 fused with the depthwise spatial conv:
    # the 26-channel contraction goes on the MXU first (default precision,
    # f32 accumulation).
    u = jnp.dot(wdw, x, preferred_element_type=jnp.float32)       # (16, NB)

    # 3-tap temporal stencil with zero padding per batch segment (masks zero
    # the wrapped / cross-segment lanes).  jnp.roll (two lane slices) keeps
    # exact shift semantics; arrays here are small (16, NB).
    u_m = jnp.roll(u, 1, axis=-1) * mask_m
    u_p = jnp.roll(u, -1, axis=-1) * mask_p
    a2 = c_m * u_m + c_0 * u + c_p * u_p + c_b
    y2 = jnp.where(a2 > 0, a2, jnp.exp(a2) - 1.0)     # ELU; dropout = identity

    # block2 depthwise temporal conv (1x3, groups=16).
    y2_m = jnp.roll(y2, 1, axis=-1) * mask_m
    y2_p = jnp.roll(y2, -1, axis=-1) * mask_p
    z3 = w3m * y2_m + w30 * y2 + w3p * y2_p

    # pointwise 16x16 conv (+ folded BN3 scale) on the MXU, shift, ELU.
    a4 = jnp.dot(w4, z3, preferred_element_type=jnp.float32) + b3
    y4 = jnp.where(a4 > 0, a4, jnp.exp(a4) - 1.0)

    # AvgPool2d((1,2)): pair sums via a 1-lane shift; the wrapper keeps only
    # the even columns, so any cross-segment / wraparound leak is discarded.
    pool_ref[0] = 0.5 * (y4 + jnp.roll(y4, -1, axis=-1))

    # classifier: AvgPool + flatten + Linear folded into wl_eff applied to y4,
    # reduced per batch segment with a 0/1 matmul, then sigmoid.
    part = jnp.dot(y4 * wl_eff, seg_ref[...],
                   preferred_element_type=jnp.float32)            # (16, BB)
    logit = jnp.sum(part, axis=0, keepdims=True) + bl             # (1, BB)
    prob_ref[0] = 1.0 / (1.0 + jnp.exp(-logit))


# --------------------------------------------------------------------------
# Deterministic parameter init (shapes from the module __init__).
# --------------------------------------------------------------------------
def init_params(key, C=IN_CHANS, T=16):
    f32 = jnp.float32
    Th = T // 2
    ks = jax.random.split(key, 9)

    w1 = (jax.random.normal(ks[0], (F1, 1, 1, 3)) / np.sqrt(3.0)).astype(f32)

    wdw = (jax.random.normal(ks[1], (F1 * D, 1, C, 1)) / np.sqrt(C)).astype(f32)
    # Conv2dWithConstraint: torch.renorm(weight, p=2, dim=0, maxnorm=1)
    norms = jnp.sqrt(jnp.sum(wdw.reshape(F1 * D, -1) ** 2, axis=1))
    scale = jnp.where(norms > 1.0, 1.0 / (norms + 1e-7), 1.0)
    wdw = wdw * scale.reshape(F1 * D, 1, 1, 1)

    w3 = (jax.random.normal(ks[2], (F2, 1, 1, 3)) / np.sqrt(3.0)).astype(f32)
    w4 = (jax.random.normal(ks[3], (F2, F2, 1, 1)) / np.sqrt(F2)).astype(f32)

    def bn(k, n, eps=1e-3):
        k1, k2, k3, k4 = jax.random.split(k, 4)
        gamma = 1.0 + 0.1 * jax.random.normal(k1, (n,))
        beta = 0.1 * jax.random.normal(k2, (n,))
        mean = 0.1 * jax.random.normal(k3, (n,))
        var = 1.0 + 0.1 * jnp.abs(jax.random.normal(k4, (n,)))
        s = gamma / jnp.sqrt(var + eps)
        return s.astype(f32), (beta - mean * s).astype(f32)

    s1, b1 = bn(ks[4], F1)
    s2, b2 = bn(ks[5], F1 * D)
    s3, b3 = bn(ks[6], F2)

    dim_feat = F2 * Th
    wl = (jax.random.normal(ks[7], (1, dim_feat)) / np.sqrt(dim_feat)).astype(f32)
    bl = (0.1 * jax.random.normal(ks[8], (1,))).astype(f32)

    return dict(w1=w1, wdw=wdw, w3=w3, w4=w4, s1=s1, b1=b1,
                s2=s2, b2=b2, s3=s3, b3=b3, wl=wl, bl=bl)


# --------------------------------------------------------------------------
# Glue: pack parameters / lane-periodic aux / segment matrix.
# --------------------------------------------------------------------------
def _pack_params(p, C):
    f32 = jnp.float32
    idx = np.arange(F2) // D                       # out channel f -> group f//D
    wdw = p['wdw'].reshape(F2, C).astype(f32)      # (16, 26)
    w1r = p['w1'].reshape(F1, 3)[idx]              # (16, 3)
    s1r = p['s1'][idx]
    b1r = p['b1'][idx]
    s2, b2 = p['s2'], p['b2']
    s3, b3 = p['s3'], p['b3']
    rowsum = jnp.sum(wdw, axis=1)

    c_m = (s2 * s1r * w1r[:, 0])[:, None]
    c_0 = (s2 * s1r * w1r[:, 1])[:, None]
    c_p = (s2 * s1r * w1r[:, 2])[:, None]
    c_b = (s2 * b1r * rowsum + b2)[:, None]
    w3 = p['w3'].reshape(F2, 3)
    w4e = s3[:, None] * p['w4'].reshape(F2, F2)
    bl_col = jnp.zeros((F2, 1), f32).at[0, 0].set(p['bl'][0])

    slab = jnp.concatenate(
        [wdw, c_m, c_0, c_p, c_b,
         w3[:, 0:1], w3[:, 1:2], w3[:, 2:3],
         b3[:, None], w4e, bl_col], axis=1).astype(f32)
    assert slab.shape == (F2, _P_COLS)
    return slab


def _lane_aux(p, T, BB):
    Th = T // 2
    NB = BB * T
    wl = p['wl'].reshape(F2, Th)                   # flatten order (c, t)
    wl_eff_T = jnp.zeros((F2, T), jnp.float32)
    wl_eff_T = wl_eff_T.at[:, 0:2 * Th].set(0.5 * jnp.repeat(wl, 2, axis=1))
    wl_eff = jnp.tile(wl_eff_T, (1, BB))           # (16, NB)
    t_idx = np.arange(NB) % T
    mask_m = jnp.asarray(t_idx != 0, jnp.float32)[None, :]
    mask_p = jnp.asarray(t_idx != T - 1, jnp.float32)[None, :]
    aux = jnp.concatenate([wl_eff, mask_m, mask_p], axis=0)   # (18, NB)
    b_idx = np.arange(NB) // T
    seg = jnp.asarray(b_idx[:, None] == np.arange(BB)[None, :],
                      jnp.float32)                 # (NB, BB)
    return aux, seg


def _choose_batch_block(B, T, target_lanes=2048):
    # Keep slabs lane-dense but VMEM-modest (v7x-safe), and keep >= 2 grid
    # steps when B allows (v7x has 2 TensorCores).
    divisors = [d for d in range(1, B + 1) if B % d == 0]
    cands = [d for d in divisors if d * T <= target_lanes] or [1]
    multi = [d for d in cands if B // d >= 2]
    return max(multi or cands)


# --------------------------------------------------------------------------
# Wrapper: pallas_call with a batch-blocked grid.
# --------------------------------------------------------------------------
def eegnet_fnirs_forward(x, params):
    """x: (B, 1, 26, T) NCHW.  Returns (feat (B, F2*(T//2)), prob (B, 1))."""
    B, _, C, T = x.shape
    Th = T // 2
    BB = _choose_batch_block(B, T)
    G = B // BB
    NB = BB * T

    # (B,1,C,T) -> (G, C, BB*T): lanes inside a block are (local_batch, t).
    xb = (x.reshape(B, C, T).astype(jnp.float32)
            .reshape(G, BB, C, T).transpose(0, 2, 1, 3).reshape(G, C, NB))
    pslab = _pack_params(params, C)
    aux, seg = _lane_aux(params, T, BB)

    grid_spec = pltpu.PrefetchScalarGridSpec(
        num_scalar_prefetch=0, grid=(G,),
        in_specs=[
            pl.BlockSpec((1, C, NB), lambda g: (g, 0, 0)),      # x slab
            pl.BlockSpec((F2, _P_COLS), lambda g: (0, 0)),      # packed params
            pl.BlockSpec((F2 + 2, NB), lambda g: (0, 0)),       # wl_eff + masks
            pl.BlockSpec((NB, BB), lambda g: (0, 0)),           # segment matrix
        ],
        out_specs=[
            pl.BlockSpec((1, F2, NB), lambda g: (g, 0, 0)),     # pooled (lane-dense)
            pl.BlockSpec((1, 1, BB), lambda g: (g, 0, 0)),      # probs (lane-dense)
        ],
    )

    pooled, prob = pl.pallas_call(
        _eegnet_kernel,
        out_shape=(jax.ShapeDtypeStruct((G, F2, NB), jnp.float32),
                   jax.ShapeDtypeStruct((G, 1, BB), jnp.float32)),
        grid_spec=grid_spec,
        compiler_params=pltpu.CompilerParams(
            dimension_semantics=("parallel",)),
    )(xb, pslab, aux, seg)

    # keep the valid (even) pooled columns and restore torch.flatten(x,1) order.
    pooled = pooled.reshape(G, F2, BB, T)[:, :, :, 0:2 * Th:2]   # (G,F2,BB,Th)
    feat = pooled.transpose(0, 2, 1, 3).reshape(B, F2 * Th)
    prob = prob.reshape(B, 1)
    return feat, prob


def eegnet_fnirs_pallas(x, params, cls=False):
    feat, prob = eegnet_fnirs_forward(x, params)
    return prob if cls else feat


# --------------------------------------------------------------------------
# Pure-JAX reference (lax convs, HIGHEST precision) for validation.
# --------------------------------------------------------------------------
def reference_forward(x, p, cls=False):
    dn = ('NCHW', 'OIHW', 'NCHW')
    hi = jax.lax.Precision.HIGHEST
    y = jax.lax.conv_general_dilated(x, p['w1'], (1, 1), [(0, 0), (1, 1)],
                                     dimension_numbers=dn, precision=hi)
    y = y * p['s1'].reshape(1, -1, 1, 1) + p['b1'].reshape(1, -1, 1, 1)
    y = jax.lax.conv_general_dilated(y, p['wdw'], (1, 1), [(0, 0), (0, 0)],
                                     dimension_numbers=dn,
                                     feature_group_count=F1, precision=hi)
    y = y * p['s2'].reshape(1, -1, 1, 1) + p['b2'].reshape(1, -1, 1, 1)
    y = jnp.where(y > 0, y, jnp.exp(y) - 1.0)
    y = jax.lax.conv_general_dilated(y, p['w3'], (1, 1), [(0, 0), (1, 1)],
                                     dimension_numbers=dn,
                                     feature_group_count=F1 * D, precision=hi)
    y = jax.lax.conv_general_dilated(y, p['w4'], (1, 1), [(0, 0), (0, 0)],
                                     dimension_numbers=dn, precision=hi)
    y = y * p['s3'].reshape(1, -1, 1, 1) + p['b3'].reshape(1, -1, 1, 1)
    y = jnp.where(y > 0, y, jnp.exp(y) - 1.0)
    Tt = (y.shape[-1] // 2) * 2
    y = 0.5 * (y[..., 0:Tt:2] + y[..., 1:Tt:2])       # AvgPool (1,2)
    feat = y.reshape(y.shape[0], -1)
    if cls:
        return jax.nn.sigmoid(feat @ p['wl'].T + p['bl'])
    return feat


if __name__ == "__main__":
    key = jax.random.PRNGKey(0)
    kparam, kx = jax.random.split(key)
    B, C, T = 2, IN_CHANS, 16            # small T (module default is 371)
    params = init_params(kparam, C=C, T=T)
    x = jax.random.normal(kx, (B, 1, C, T), dtype=jnp.float32)

    feat = eegnet_fnirs_pallas(x, params, cls=False)   # default module path
    prob = eegnet_fnirs_pallas(x, params, cls=True)    # cls=True path
    jax.block_until_ready((feat, prob))

    ref_feat = reference_forward(x, params, cls=False)
    ref_prob = reference_forward(x, params, cls=True)
    # Kernel matmuls run at default MXU precision (not HIGHEST), so allow a
    # slightly looser tolerance than v1 against the HIGHEST-precision reference.
    np.testing.assert_allclose(np.asarray(feat), np.asarray(ref_feat),
                               rtol=2e-2, atol=2e-2)
    np.testing.assert_allclose(np.asarray(prob), np.asarray(ref_prob),
                               rtol=2e-2, atol=2e-2)
    print("KERNEL_OK")
</pallas_src>

<mosaic_0001>
module attributes {stable_mosaic.version = 11 : i64} {
  func.func @_eegnet_kernel(%arg0: i32, %arg1: memref<1x26x16xf32, #tpu.memory_space<vmem>>, %arg2: memref<16x51xf32, #tpu.memory_space<vmem>>, %arg3: memref<18x16xf32, #tpu.memory_space<vmem>>, %arg4: memref<16x1xf32, #tpu.memory_space<vmem>>, %arg5: memref<1x16x16xf32, #tpu.memory_space<vmem>>, %arg6: memref<1x1x1xf32, #tpu.memory_space<vmem>>) attributes {dimension_semantics = [#tpu.dimension_semantics<parallel>], iteration_bounds = array<i64: 2>, scalar_prefetch = 0 : i64, scratch_operands = 0 : i64, tpu.core_type = #tpu.core_type<tc>, window_params = [{transform_indices = @transform_0, window_bounds = array<i64: 1, 26, 16>}, {pipeline_mode = #tpu.pipeline_mode<synchronous>, transform_indices = @transform_1, window_bounds = array<i64: 16, 51>}, {pipeline_mode = #tpu.pipeline_mode<synchronous>, transform_indices = @transform_2, window_bounds = array<i64: 18, 16>}, {pipeline_mode = #tpu.pipeline_mode<synchronous>, transform_indices = @transform_3, window_bounds = array<i64: 16, 1>}, {transform_indices = @transform_4, window_bounds = array<i64: 1, 16, 16>}, {transform_indices = @transform_5, window_bounds = array<i64: 1, 1, 1>}]} {
    %c0 = arith.constant 0 : index
    %c0_0 = arith.constant 0 : index
    %c0_1 = arith.constant 0 : index
    %0 = vector.load %arg1[%c0, %c0_0, %c0_1] : memref<1x26x16xf32, #tpu.memory_space<vmem>>, vector<1x26x16xf32>
    %1 = vector.shape_cast %0 : vector<1x26x16xf32> to vector<26x16xf32>
    %c0_2 = arith.constant 0 : index
    %c0_3 = arith.constant 0 : index
    %2 = vector.load %arg2[%c0_2, %c0_3] : memref<16x51xf32, #tpu.memory_space<vmem>>, vector<16x51xf32>
    %3 = vector.extract_strided_slice %2 {offsets = [0, 0], sizes = [16, 26], strides = [1, 1]} : vector<16x51xf32> to vector<16x26xf32>
    %4 = vector.extract_strided_slice %2 {offsets = [0, 26], sizes = [16, 1], strides = [1, 1]} : vector<16x51xf32> to vector<16x1xf32>
    %5 = vector.extract_strided_slice %2 {offsets = [0, 27], sizes = [16, 1], strides = [1, 1]} : vector<16x51xf32> to vector<16x1xf32>
    %6 = vector.extract_strided_slice %2 {offsets = [0, 28], sizes = [16, 1], strides = [1, 1]} : vector<16x51xf32> to vector<16x1xf32>
    %7 = vector.extract_strided_slice %2 {offsets = [0, 29], sizes = [16, 1], strides = [1, 1]} : vector<16x51xf32> to vector<16x1xf32>
    %8 = vector.extract_strided_slice %2 {offsets = [0, 30], sizes = [16, 1], strides = [1, 1]} : vector<16x51xf32> to vector<16x1xf32>
    %9 = vector.extract_strided_slice %2 {offsets = [0, 31], sizes = [16, 1], strides = [1, 1]} : vector<16x51xf32> to vector<16x1xf32>
    %10 = vector.extract_strided_slice %2 {offsets = [0, 32], sizes = [16, 1], strides = [1, 1]} : vector<16x51xf32> to vector<16x1xf32>
    %11 = vector.extract_strided_slice %2 {offsets = [0, 33], sizes = [16, 1], strides = [1, 1]} : vector<16x51xf32> to vector<16x1xf32>
    %12 = vector.extract_strided_slice %2 {offsets = [0, 34], sizes = [16, 16], strides = [1, 1]} : vector<16x51xf32> to vector<16x16xf32>
    %13 = vector.extract_strided_slice %2 {offsets = [0, 50], sizes = [1, 1], strides = [1, 1]} : vector<16x51xf32> to vector<1x1xf32>
    %c0_4 = arith.constant 0 : index
    %c0_5 = arith.constant 0 : index
    %14 = vector.load %arg3[%c0_4, %c0_5] : memref<18x16xf32, #tpu.memory_space<vmem>>, vector<16x16xf32>
    %c16 = arith.constant 16 : index
    %c0_6 = arith.constant 0 : index
    %15 = vector.load %arg3[%c16, %c0_6] : memref<18x16xf32, #tpu.memory_space<vmem>>, vector<1x16xf32>
    %c17 = arith.constant 17 : index
    %c0_7 = arith.constant 0 : index
    %16 = vector.load %arg3[%c17, %c0_7] : memref<18x16xf32, #tpu.memory_space<vmem>>, vector<1x16xf32>
    %cst = arith.constant dense<0.000000e+00> : vector<16x16xf32>
    %17 = tpu.matmul %3, %1, %cst {dimension_numbers = #tpu.dot_dimension_numbers<[1], [0], [0], [1], [0, 0, 1, 1], [], []>} : vector<16x26xf32>, vector<26x16xf32>, vector<16x16xf32> -> vector<16x16xf32>
    %18 = vector.extract_strided_slice %17 {offsets = [0, 15], sizes = [16, 1], strides = [1, 1]} : vector<16x16xf32> to vector<16x1xf32>
    %19 = vector.extract_strided_slice %17 {offsets = [0, 0], sizes = [16, 15], strides = [1, 1]} : vector<16x16xf32> to vector<16x15xf32>
    %20 = tpu.concatenate %18, %19 in 1 : vector<16x1xf32>, vector<16x15xf32> -> vector<16x16xf32>
    %21 = vector.broadcast %15 : vector<1x16xf32> to vector<16x16xf32>
    %22 = arith.mulf %20, %21 : vector<16x16xf32>
    %23 = vector.extract_strided_slice %17 {offsets = [0, 1], sizes = [16, 15], strides = [1, 1]} : vector<16x16xf32> to vector<16x15xf32>
    %24 = vector.extract_strided_slice %17 {offsets = [0, 0], sizes = [16, 1], strides = [1, 1]} : vector<16x16xf32> to vector<16x1xf32>
    %25 = tpu.concatenate %23, %24 in 1 : vector<16x15xf32>, vector<16x1xf32> -> vector<16x16xf32>
    %26 = vector.broadcast %16 : vector<1x16xf32> to vector<16x16xf32>
    %27 = arith.mulf %25, %26 : vector<16x16xf32>
    %28 = vector.broadcast %4 : vector<16x1xf32> to vector<16x16xf32>
    %29 = arith.mulf %28, %22 : vector<16x16xf32>
    %30 = vector.broadcast %5 : vector<16x1xf32> to vector<16x16xf32>
    %31 = arith.mulf %30, %17 : vector<16x16xf32>
    %32 = arith.addf %29, %31 : vector<16x16xf32>
    %33 = vector.broadcast %6 : vector<16x1xf32> to vector<16x16xf32>
    %34 = arith.mulf %33, %27 : vector<16x16xf32>
    %35 = arith.addf %32, %34 : vector<16x16xf32>
    %36 = vector.broadcast %7 : vector<16x1xf32> to vector<16x16xf32>
    %37 = arith.addf %35, %36 : vector<16x16xf32>
    %cst_8 = arith.constant 0.000000e+00 : f32
    %38 = vector.broadcast %cst_8 : f32 to vector<16x16xf32>
    %39 = arith.cmpf ogt, %37, %38 : vector<16x16xf32>
    %40 = math.exp %37 : vector<16x16xf32>
    %cst_9 = arith.constant 1.000000e+00 : f32
    %41 = vector.broadcast %cst_9 : f32 to vector<16x16xf32>
    %42 = arith.subf %40, %41 : vector<16x16xf32>
    %43 = arith.select %39, %37, %42 : vector<16x16xi1>, vector<16x16xf32>
    %44 = vector.extract_strided_slice %43 {offsets = [0, 15], sizes = [16, 1], strides = [1, 1]} : vector<16x16xf32> to vector<16x1xf32>
    %45 = vector.extract_strided_slice %43 {offsets = [0, 0], sizes = [16, 15], strides = [1, 1]} : vector<16x16xf32> to vector<16x15xf32>
    %46 = tpu.concatenate %44, %45 in 1 : vector<16x1xf32>, vector<16x15xf32> -> vector<16x16xf32>
    %47 = vector.broadcast %15 : vector<1x16xf32> to vector<16x16xf32>
    %48 = arith.mulf %46, %47 : vector<16x16xf32>
    %49 = vector.extract_strided_slice %43 {offsets = [0, 1], sizes = [16, 15], strides = [1, 1]} : vector<16x16xf32> to vector<16x15xf32>
    %50 = vector.extract_strided_slice %43 {offsets = [0, 0], sizes = [16, 1], strides = [1, 1]} : vector<16x16xf32> to vector<16x1xf32>
    %51 = tpu.concatenate %49, %50 in 1 : vector<16x15xf32>, vector<16x1xf32> -> vector<16x16xf32>
    %52 = vector.broadcast %16 : vector<1x16xf32> to vector<16x16xf32>
    %53 = arith.mulf %51, %52 : vector<16x16xf32>
    %54 = vector.broadcast %8 : vector<16x1xf32> to vector<16x16xf32>
    %55 = arith.mulf %54, %48 : vector<16x16xf32>
    %56 = vector.broadcast %9 : vector<16x1xf32> to vector<16x16xf32>
    %57 = arith.mulf %56, %43 : vector<16x16xf32>
    %58 = arith.addf %55, %57 : vector<16x16xf32>
    %59 = vector.broadcast %10 : vector<16x1xf32> to vector<16x16xf32>
    %60 = arith.mulf %59, %53 : vector<16x16xf32>
    %61 = arith.addf %58, %60 : vector<16x16xf32>
    %cst_10 = arith.constant dense<0.000000e+00> : vector<16x16xf32>
    %62 = tpu.matmul %12, %61, %cst_10 {dimension_numbers = #tpu.dot_dimension_numbers<[1], [0], [0], [1], [0, 0, 1, 1], [], []>} : vector<16x16xf32>, vector<16x16xf32>, vector<16x16xf32> -> vector<16x16xf32>
    %63 = vector.broadcast %11 : vector<16x1xf32> to vector<16x16xf32>
    %64 = arith.addf %62, %63 : vector<16x16xf32>
    %cst_11 = arith.constant 0.000000e+00 : f32
    %65 = vector.broadcast %cst_11 : f32 to vector<16x16xf32>
    %66 = arith.cmpf ogt, %64, %65 : vector<16x16xf32>
    %67 = math.exp %64 : vector<16x16xf32>
    %cst_12 = arith.constant 1.000000e+00 : f32
    %68 = vector.broadcast %cst_12 : f32 to vector<16x16xf32>
    %69 = arith.subf %67, %68 : vector<16x16xf32>
    %70 = arith.select %66, %64, %69 : vector<16x16xi1>, vector<16x16xf32>
    %71 = vector.extract_strided_slice %70 {offsets = [0, 1], sizes = [16, 15], strides = [1, 1]} : vector<16x16xf32> to vector<16x15xf32>
    %72 = vector.extract_strided_slice %70 {offsets = [0, 0], sizes = [16, 1], strides = [1, 1]} : vector<16x16xf32> to vector<16x1xf32>
    %73 = tpu.concatenate %71, %72 in 1 : vector<16x15xf32>, vector<16x1xf32> -> vector<16x16xf32>
    %74 = arith.addf %70, %73 : vector<16x16xf32>
    %cst_13 = arith.constant 5.000000e-01 : f32
    %75 = vector.broadcast %cst_13 : f32 to vector<16x16xf32>
    %76 = arith.mulf %75, %74 : vector<16x16xf32>
    %c0_14 = arith.constant 0 : index
    %c0_15 = arith.constant 0 : index
    %c0_16 = arith.constant 0 : index
    %77 = vector.load %arg5[%c0_14, %c0_15, %c0_16] : memref<1x16x16xf32, #tpu.memory_space<vmem>>, vector<1x16x16xf32>
    %78 = vector.shape_cast %77 : vector<1x16x16xf32> to vector<16x16xf32>
    %79 = vector.shape_cast %76 : vector<16x16xf32> to vector<1x16x16xf32>
    tpu.vector_store %arg5[%c0_14, %c0_15, %c0_16], %79 {strides = array<i32>} : memref<1x16x16xf32, #tpu.memory_space<vmem>>, vector<1x16x16xf32>,
    %80 = arith.mulf %70, %14 : vector<16x16xf32>
    %c0_17 = arith.constant 0 : index
    %c0_18 = arith.constant 0 : index
    %81 = vector.load %arg4[%c0_17, %c0_18] : memref<16x1xf32, #tpu.memory_space<vmem>>, vector<16x1xf32>
    %cst_19 = arith.constant dense<0.000000e+00> : vector<16x1xf32>
    %82 = tpu.matmul %80, %81, %cst_19 {dimension_numbers = #tpu.dot_dimension_numbers<[1], [0], [0], [1], [0, 0, 1, 1], [], []>} : vector<16x16xf32>, vector<16x1xf32>, vector<16x1xf32> -> vector<16x1xf32>
    %cst_20 = arith.constant dense<0.000000e+00> : vector<1xf32>
    %83 = vector.multi_reduction <add>, %82, %cst_20 [0] : vector<16x1xf32> to vector<1xf32>
    %84 = vector.shape_cast %83 : vector<1xf32> to vector<1x1xf32>
    %85 = arith.addf %84, %13 : vector<1x1xf32>
    %cst_21 = arith.constant 0.000000e+00 : f32
    %86 = vector.broadcast %cst_21 : f32 to vector<1x1xf32>
    %87 = arith.subf %86, %85 : vector<1x1xf32>
    %88 = math.exp %87 : vector<1x1xf32>
    %cst_22 = arith.constant 1.000000e+00 : f32
    %89 = vector.broadcast %cst_22 : f32 to vector<1x1xf32>
    %90 = arith.addf %89, %88 : vector<1x1xf32>
    %cst_23 = arith.constant 1.000000e+00 : f32
    %91 = vector.broadcast %cst_23 : f32 to vector<1x1xf32>
    %92 = arith.divf %91, %90 : vector<1x1xf32>
    %c0_24 = arith.constant 0 : index
    %c0_25 = arith.constant 0 : index
    %c0_26 = arith.constant 0 : index
    %93 = vector.load %arg6[%c0_24, %c0_25, %c0_26] : memref<1x1x1xf32, #tpu.memory_space<vmem>>, vector<1x1x1xf32>
    %94 = vector.shape_cast %93 : vector<1x1x1xf32> to vector<1x1xf32>
    %95 = vector.shape_cast %92 : vector<1x1xf32> to vector<1x1x1xf32>
    tpu.vector_store %arg6[%c0_24, %c0_25, %c0_26], %95 {strides = array<i32>} : memref<1x1x1xf32, #tpu.memory_space<vmem>>, vector<1x1x1xf32>,
    return
  }
  func.func @transform_0(%arg0: i32) -> (i32, i32, i32) {
    %c0_i32 = arith.constant 0 : i32
    %c0_i32_0 = arith.constant 0 : i32
    %c0_i32_1 = arith.constant 0 : i32
    return %arg0, %c0_i32, %c0_i32_0 : i32, i32, i32
  }
  func.func @transform_1(%arg0: i32) -> (i32, i32) {
    %c0_i32 = arith.constant 0 : i32
    %c0_i32_0 = arith.constant 0 : i32
    %c0_i32_1 = arith.constant 0 : i32
    return %c0_i32, %c0_i32_0 : i32, i32
  }
  func.func @transform_2(%arg0: i32) -> (i32, i32) {
    %c0_i32 = arith.constant 0 : i32
    %c0_i32_0 = arith.constant 0 : i32
    %c0_i32_1 = arith.constant 0 : i32
    return %c0_i32, %c0_i32_0 : i32, i32
  }
  func.func @transform_3(%arg0: i32) -> (i32, i32) {
    %c0_i32 = arith.constant 0 : i32
    %c0_i32_0 = arith.constant 0 : i32
    %c0_i32_1 = arith.constant 0 : i32
    return %c0_i32, %c0_i32_0 : i32, i32
  }
  func.func @transform_4(%arg0: i32) -> (i32, i32, i32) {
    %c0_i32 = arith.constant 0 : i32
    %c0_i32_0 = arith.constant 0 : i32
    %c0_i32_1 = arith.constant 0 : i32
    return %arg0, %c0_i32, %c0_i32_0 : i32, i32, i32
  }
  func.func @transform_5(%arg0: i32) -> (i32, i32, i32) {
    %c0_i32 = arith.constant 0 : i32
    %c0_i32_0 = arith.constant 0 : i32
    %c0_i32_1 = arith.constant 0 : i32
    return %arg0, %c0_i32, %c0_i32_0 : i32, i32, i32
  }
}

</mosaic_0001>

<bundles_post_ra>
// kernel: tpu_custom_call.1
= control target key start
LH: loop header
LB: loop body
LE: loop exit
PB: predicated region body
PF: predicated region fallthrough
CT: control target
= control target key end

     0   :  { %11 = vsyncpa [#allocation3], 0  ;;  %s1093_s0 = inlined_call_operand.vmem [shape: f32[2,26,16], index: 0, kind: input, shape index: {}]   ;;  %s1094_s1 = inlined_call_operand.vmem [shape: f32[16,51], index: 1, kind: input, shape index: {}]   ;;  %s1095_s2 = inlined_call_operand.vmem [shape: f32[18,16], index: 2, kind: input, shape index: {}]   ;;  %s1096_s3 = inlined_call_operand.vmem [shape: f32[16,1], index: 3, kind: input, shape index: {}]   ;;  %s1097_s4 = inlined_call_operand.hbm [shape: f32[2,16,16], index: 4, kind: output, shape index: {0}]   ;;  %s1098_s5 = inlined_call_operand.vmem [shape: f32[2,1,1], index: 5, kind: output, shape index: {1}]  }
   0x1   :  { %13 = vsyncpa [#allocation3 + $0x1], 0  ;;  %s902_s18 = smov 0   ;;  %s904_s19 = smov 0  }
   0x2   :  { %s906_s20 = smov 0   ;;  %s908_s21 = smov 0  }
   0x3 LB: > { %s923_s22 = sadd.s32 4294967295, %s854_s21   ;;  %s678_s23 = sadd.s32 4294967294, %s854_s21   ;;  %s854_s21 = sphi %s908_s21, %s1104_s21   ;;  %s850_s20 = sphi %s906_s20, %s1103_s20   ;;  %s846_s19 = sphi %s904_s19, %s1102_s19   ;;  %s842_s18 = sphi %s902_s18, %s1101_s18  }
   0x4   : > { %s927_s24 = sadd.s32 1, %s854_s21   ;;  %s115_s25 = sadd.s32 1, %s850_s20 }
   0x5   : > { %s112_s26 = ssub.s32 %s854_s21, %s927_s24  ;;  %p125_p0 = scmp.ne.s32.totalorder %s850_s20, %s846_s19 }
   0x6   : > { %p113_p1 = scmp.eq.s32.totalorder %s112_s26, 0  ;;  %p126_p2 = scmp.eq.s32.totalorder %s923_s22, 1 }
   0x7   : > { %p131_p3 = scmp.ne.s32.totalorder %s846_s19, %s842_s18  ;;  %p132_p4 = scmp.eq.s32.totalorder %s678_s23, 1 }
   0x8   : > { %s938_s27 = scalar_select %p113_p1, %s850_s20, %s115_s25  }
   0x9   : > { %p940_p5 = por %p126_p2, %p125_p0  ;;  %p944_p6 = por %p132_p4, %p131_p3 }
   0xa   : > { %p681_p7 = scmp.ge.s32.totalorder %s854_s21, 1  ;;  %p193_p8 = scmp.lt.s32.totalorder %s854_s21, 3 }
   0xc   : > { %p194_p9 = pnand %p681_p7, %p193_p8 }
   0xd   : > { %p224_p10 = scmp.lt.s32.totalorder (!%p194_p9), %s923_s22, 1  ;;  %s859_s14 = smov (!%p194_p9), 127  }
   0xe   : > { %197 = sbr.rel (%p194_p9) target bundleno = 792 (0x318), region = 36  ;;  %s860_s15 = smov (!%p194_p9), 113  }
   0xf   : > { %s861_s16 = smov (!%p194_p9), 1   ;;  %s862_s17 = smov (!%p194_p9), 15  }
  0x10   : > { %s867_s6 = smov (!%p194_p9), 94   ;;  %s869_s8 = smov (!%p194_p9), 78  }
  0x11   : > { %s216_s25 = sand.u32 (!%p194_p9), 1, %s846_s19   ;;  %s702_s30 = sshll.u32 (!%p194_p9), %s923_s22, 4 }
  0x12   : > { %s682_s26 = sshll.u32 (!%p194_p9), %s216_s25, 4  ;;  %s590_s9 = scalar_lea.hbm (!%p194_p9), %s1097_s4, %s702_s30 }
  0x13   : > { %v954_v0 = vld [vmem:[%s1094_s1 + $0x8] sm:$0xff]  ;;  %v856_v1 = vmov 27   ;;  %s957_s7 = scalar_select %p224_p10, %s923_s22, 1  ;;  %v962_v2 = vld [vmem:[%s1094_s1] sm:$0xff]  ;;  %v857_v3 = vmov 26   ;;  %vm249_vm0 = vcmask 1041408  }
  0x14   : > { %763 = vset.pattern.permute.xlu1 %v856_v1  ;;  %764 = vset.pattern.permute.xlu2 %v857_v3  ;;  %vm242_vm1 = vcmask 211968   ;;  %v858_v8 = vmov 28   ;;  %v863_v11 = vmov 29   ;;  %v864_v12 = vmov 31   ;;  %v992_v24 = vld [vmem:[%s1095_s2 + $0x10] ss:$0 sm:$0xff] }
  0x15   : > { %329 = vperm.xlu1 %763, %v954_v0   ;;  %315 = vperm.xlu2 %764, %v962_v2   ;;  %s701_s10 = sshll.u32 %s957_s7, 5  ;;  %v865_v19 = vmov 30   ;;  %vm290_vm2 = vcmask 7168   ;;  %vm308_vm3 = vcmask 121856   ;;  %v1001_v31 = vld [vmem:[%s1095_s2 + $0x11] ss:$0 sm:$0xff] }
  0x16   : > { %762 = vset.pattern.permute.xlu0 %v857_v3  ;;  %s228_s13 = scalar_lea.vmem %s1093_s0, %s701_s10  ;;  %v866_v48 = vmov 32   ;;  %vm448_vm6 = vcmask 130048   ;;  %s593_s10 = sshll.u32 %s590_s9, 4  ;;  %s594_s10 = int_to_ptr.hbm [resolvable:$true] %s593_s10 }
  0x17   : > { %319 = vperm.xlu0 %762, %v954_v0   ;;  %v235_v4 = vld [vmem:[%s228_s13 + $0x18] sm:$0x3]  ;;  %v234_v5 = vld [vmem:[%s228_s13 + $0x10] sm:$0xff]  ;;  %v233_v6 = vld [vmem:[%s228_s13 + $0x8] sm:$0xff]  ;;  %s576_s22 = scalar_lea.sflag [#allocation3], %s216_s25  ;;  %s806_s11 = sshra.s32 %s594_s10, 4  ;;  %s807_s11 = int_to_ptr.hbm [resolvable:$true] %s806_s11 }
  0x18   : > { %685 = vmatpush.msk.msra.mxu0 %vm249_vm0, %v235_v4  ;;  %703 = vmatpush.msk.msra.mxu3 %vm249_vm0, %v235_v4  ;;  %v232_v7 = vld [vmem:[%s228_s13] sm:$0xff]  ;;  %s808_s12 = scalar_lea.hbm %s807_s11, 16  ;;  %p813_p0 = scmp.lt.s32.totalorder %s807_s11, %s1097_s4 }
  0x19   : > { %p809_p11 = scmp.ne.s32.totalorder %s807_s11, %s808_s12 }
  0x1a   : > { %266 = vmatpush.msra.mxu0 %v234_v5  ;;  %704 = vmatpush.msra.mxu3 %v234_v5 }
  0x1b   : > { %p810_p12 = pnand %p809_p11, %p940_p5 }
  0x1c   : > { %267 = vmatpush.msra.mxu0 %v233_v6  ;;  %705 = vmatpush.msra.mxu3 %v233_v6 }
  0x1d   : > { %766 = vset.pattern.permute.xlu1 %v858_v8  ;;  %767 = vset.pattern.permute.xlu2 %v858_v8  ;;  %v868_v8 = vmov 33   ;;  %p811_p13 = pneg %p810_p12 }
  0x1e   : > { %268 = vmatpush.msra.mxu0 %v232_v7  ;;  %706 = vmatpush.msra.mxu3 %v232_v7 }
  0x1f   : > { %765 = vset.pattern.permute.xlu0 %v856_v1  ;;  %686 = vmatmul.msk.f32.vlgmr.msra.gmra.mxu0 %vm242_vm1, %v962_v2 }
  0x20   : > { %687 = vmatmul.msk.f32.vlgmr.msra.gmra.mxu3 %vm242_vm1, %v954_v0 }
  0x6f   : > { %v316_v13 = vpop.permute.xlu2 %315 }
  0x87   : > { %v330_v15 = vpop.permute.xlu1 %329 }
  0x89   : > { %v320_v16 = vpop.permute.xlu0 %319 }
  0x9c   : > { %v270_v9 = vpop.f32.mrf.mxu0 }
  0x9d   : > { %296 = vrot.lane.b32.xlu2 %v270_v9, %s859_s14  ;;  %278 = vrot.lane.b32.xlu1 %v270_v9, %s860_s15 }
  0xa3   : > { %v273_v10 = vpop.f32.mrf.mxu3 }
  0xa4   : > { %280 = vrot.lane.b32.xlu0 %v273_v10, %s860_s15  ;;  %v333_v45 = vmul.f32 %v330_v15, %v273_v10 }
  0xa5   : > { %298 = vrot.lane.b32.xlu2 %v273_v10, %s859_s14  ;;  %284 = vrot.lane.b32.xlu1 %v270_v9, %s861_s16 }
  0xac   : > { %286 = vrot.lane.b32.xlu0 %v273_v10, %s861_s16 }
  0xad   : > { %304 = vrot.lane.b32.xlu2 %v273_v10, %s862_s17  ;;  %302 = vrot.lane.b32.xlu1 %v270_v9, %s862_s17 }
  0xb4   : > { %325 = vperm.xlu0 %765, %v962_v2  }
  0xb5   : > { %341 = vperm.xlu1 %766, %v954_v0   ;;  %337 = vperm.xlu2 %767, %v962_v2  }
  0xbc   : > { %770 = vset.pattern.permute.xlu0 %v865_v19 }
  0xbd   : > { %768 = vset.pattern.permute.xlu1 %v863_v11  ;;  %769 = vset.pattern.permute.xlu2 %v863_v11 }
  0xbe   : > { %353 = vperm.xlu1 %768, %v954_v0   ;;  %349 = vperm.xlu2 %769, %v962_v2  }
  0xbf   : > { %407 = vperm.xlu0 %770, %v954_v0  }
  0xc6   : > { %771 = vset.pattern.permute.xlu1 %v864_v12  ;;  %772 = vset.pattern.permute.xlu2 %v865_v19 }
  0xc7   : > { %417 = vperm.xlu1 %771, %v954_v0   ;;  %403 = vperm.xlu2 %772, %v962_v2  }
  0xc8   : > { %773 = vset.pattern.permute.xlu0 %v864_v12 }
  0xcf   : > { %774 = vset.pattern.permute.xlu1 %v866_v48  ;;  %775 = vset.pattern.permute.xlu2 %v866_v48 }
  0xf7   : > { %v297_v14 = vpop.permute.xlu2 %296 }
  0xff   : > { %v299_v17 = vpop.permute.xlu2 %298 }
 0x107   : > { %v305_v21 = vpop.permute.xlu2 %304 }
 0x108   : > { %v310_v35 = vsel %vm308_vm3, %v299_v17, %v305_v21 }
 0x109   : > { %v313_v42 = vmul.f32 %v1001_v31, %v310_v35 }
 0x10f   : > { %v279_v18 = vpop.permute.xlu1 %278  ;;  %v338_v27 = vpop.permute.xlu2 %337 }
 0x116   : > { %v281_v20 = vpop.permute.xlu0 %280 }
 0x117   : > { %v285_v22 = vpop.permute.xlu1 %284 }
 0x118   : > { %v291_v25 = vsel %vm290_vm2, %v279_v18, %v285_v22  ;;  %v350_v43 = vpop.permute.xlu2 %349 }
 0x119   : > { %v294_v29 = vmul.f32 %v992_v24, %v291_v25 }
 0x11b   : > { %v322_v36 = vmul.f32 %v316_v13, %v294_v29 }
 0x11e   : > { %v287_v23 = vpop.permute.xlu0 %286 }
 0x11f   : > { %v303_v26 = vpop.permute.xlu1 %302  ;;  %v292_v30 = vsel %vm290_vm2, %v281_v20, %v287_v23 }
 0x120   : > { %v309_v28 = vsel %vm308_vm3, %v297_v14, %v303_v26  ;;  %v295_v33 = vmul.f32 %v992_v24, %v292_v30 }
 0x121   : > { %v312_v32 = vmul.f32 %v1001_v31, %v309_v28  ;;  %v404_v61 = vpop.permute.xlu2 %403 }
 0x122   : > { %v323_v41 = vmul.f32 %v320_v16, %v295_v33 }
 0x123   : > { %v344_v39 = vmul.f32 %v338_v27, %v312_v32 }
 0x124   : > { %v335_v49 = vadd.f32 %v333_v45, %v323_v41 }
 0x126   : > { %v326_v34 = vpop.permute.xlu0 %325 }
 0x127   : > { %v332_v37 = vmul.f32 %v326_v34, %v270_v9  ;;  %v342_v38 = vpop.permute.xlu1 %341  ;;  %v510_v34 = vld [vmem:[%s1096_s3] sm:$0xff] }
 0x128   : > { %v345_v46 = vmul.f32 %v342_v38, %v313_v42 }
 0x129   : > { %v334_v40 = vadd.f32 %v332_v37, %v322_v36 }
 0x12a   : > { %v347_v51 = vadd.f32 %v345_v46, %v335_v49  ;;  %v239_v49 = vld [vmem:[%s1095_s2 + $0x8] sm:$0xff] }
 0x12b   : > { %v346_v44 = vadd.f32 %v344_v39, %v334_v40 }
 0x12d   : > { %v356_v47 = vadd.f32 %v350_v43, %v346_v44  ;;  %v238_v44 = vld [vmem:[%s1095_s2] sm:$0xff] }
 0x12f   : > { %v360_v50 = vmul.f32 1.442695, %v356_v47  ;;  %vm358_vm4 = vcmp.gt.f32.partialorder %v356_v47, 0.0 }
 0x130   : > { %v354_v52 = vpop.permute.xlu1 %353 }
 0x131   : > { %780 = vpow2.f32 %v360_v50  ;;  %v357_v53 = vadd.f32 %v354_v52, %v347_v51  ;;  %v408_v62 = vpop.permute.xlu0 %407 }
 0x133   : > { %v362_v54 = vmul.f32 1.442695, %v357_v53  ;;  %vm359_vm5 = vcmp.gt.f32.partialorder %v357_v53, 0.0 }
 0x135   : > { %782 = vpow2.f32 %v362_v54 }
 0x137   : > { %v781_v55 = vpop.eup %780 }
 0x138   : > { %v688_v56 = vadd.f32 -1.0, %v781_v55 }
 0x139   : > { %v418_v63 = vpop.permute.xlu1 %417 }
 0x13a   : > { %v366_v57 = vsel %vm358_vm4, %v356_v47, %v688_v56 }
 0x13b   : > { %392 = vrot.lane.b32.xlu1 %v366_v57, %s862_s17  ;;  %376 = vrot.lane.b32.xlu0 %v366_v57, %s861_s16  ;;  %v783_v58 = vpop.eup %782 }
 0x13c   : > { %370 = vrot.lane.b32.xlu2 %v366_v57, %s860_s15  ;;  %v689_v59 = vadd.f32 -1.0, %v783_v58 }
 0x13e   : > { %v367_v60 = vsel %vm359_vm5, %v357_v53, %v689_v59 }
 0x13f   : > { %v421_v20 = vmul.f32 %v418_v63, %v367_v60 }
 0x143   : > { %378 = vrot.lane.b32.xlu1 %v367_v60, %s861_s16  ;;  %372 = vrot.lane.b32.xlu0 %v367_v60, %s860_s15  ;;  %s812_s16 = scalar_lea.hbm %s1097_s4, 32 }
 0x144   : > { %386 = vrot.lane.b32.xlu2 %v366_v57, %s859_s14  ;;  %p814_p1 = scmp.lt.s32.totalorder %s812_s16, %s808_s12 }
 0x146   : > { %p815_p2 = por %p814_p1, %p813_p0 }
 0x148   : > { %p816_p3 = pnand %p815_p2, %p811_p13 }
 0x14b   : > { %388 = vrot.lane.b32.xlu1 %v367_v60, %s859_s14  ;;  %413 = vperm.xlu0 %773, %v962_v2  }
 0x14c   : > { %394 = vrot.lane.b32.xlu2 %v367_v60, %s862_s17 }
 0x153   : > { %429 = vperm.xlu1 %774, %v954_v0   ;;  %776 = vset.pattern.permute.xlu0 %v868_v8 }
 0x154   : > { %425 = vperm.xlu2 %775, %v962_v2   ;;  %437 = vperm.xlu0 %776, %v962_v2  }
 0x15b   : > { %444 = vrot.lane.b32.xlu1 %v962_v2, %s867_s6 }
 0x15c   : > { %446 = vrot.lane.b32.xlu2 %v954_v0, %s867_s6  ;;  %777 = vset.pattern.permute.xlu1 %v868_v8 }
 0x163   : > { %441 = vperm.xlu1 %777, %v954_v0  }
 0x164   : > { %550 = vrot.lane.b32.xlu2 %v962_v2, %s869_s8 }
 0x196   : > { %v371_v1 = vpop.permute.xlu2 %370 }
 0x19e   : > { %v387_v5 = vpop.permute.xlu2 %386 }
 0x1a6   : > { %v395_v10 = vpop.permute.xlu2 %394 }
 0x1ad   : > { %v393_v3 = vpop.permute.xlu1 %392  ;;  %v377_v4 = vpop.permute.xlu0 %376 }
 0x1ae   : > { %v382_v11 = vsel %vm290_vm2, %v371_v1, %v377_v4  ;;  %v398_v16 = vsel %vm308_vm3, %v387_v5, %v393_v3  ;;  %v426_v23 = vpop.permute.xlu2 %425 }
 0x1af   : > { %v384_v15 = vmul.f32 %v992_v24, %v382_v11  ;;  %v400_v0 = vmul.f32 %v1001_v31, %v398_v16 }
 0x1b1   : > { %v410_v21 = vmul.f32 %v404_v61, %v384_v15  ;;  %v432_v29 = vmul.f32 %v426_v23, %v400_v0 }
 0x1b5   : > { %v379_v6 = vpop.permute.xlu1 %378  ;;  %v373_v7 = vpop.permute.xlu0 %372 }
 0x1b6   : > { %v383_v9 = vsel %vm290_vm2, %v373_v7, %v379_v6  ;;  %v447_v33 = vpop.permute.xlu2 %446 }
 0x1b7   : > { %v385_v13 = vmul.f32 %v992_v24, %v383_v9 }
 0x1b9   : > { %v411_v19 = vmul.f32 %v408_v62, %v385_v13 }
 0x1bb   : > { %v423_v28 = vadd.f32 %v421_v20, %v411_v19 }
 0x1bd   : > { %v389_v12 = vpop.permute.xlu1 %388  ;;  %v414_v14 = vpop.permute.xlu0 %413 }
 0x1be   : > { %v399_v17 = vsel %vm308_vm3, %v389_v12, %v395_v10  ;;  %v420_v18 = vmul.f32 %v414_v14, %v366_v57  ;;  %v551_v52 = vpop.permute.xlu2 %550 }
 0x1bf   : > { %v401_v22 = vmul.f32 %v1001_v31, %v399_v17  ;;  %v511_v31 = vld [vmem:[%s1096_s3 + $0x8] sm:$0xff] }
 0x1c0   : > { %v422_v26 = vadd.f32 %v420_v18, %v410_v21  ;;  %532 = vmatpush.msra.mxu2 %v511_v31 }
 0x1c2   : > { %v434_v24 = vadd.f32 %v432_v29, %v422_v26  ;;  %533 = vmatpush.msra.mxu2 %v510_v34 }
 0x1c5   : > { %v430_v25 = vpop.permute.xlu1 %429 }
 0x1c6   : > { %v433_v27 = vmul.f32 %v430_v25, %v401_v22  ;;  %v438_v35 = vpop.permute.xlu0 %437 }
 0x1c8   : > { %v435_v30 = vadd.f32 %v433_v27, %v423_v28 }
 0x1ca   : > { %467 = vmatpush.msra.mxu1 %v435_v30 }
 0x1cc   : > { %468 = vmatpush.msra.mxu1 %v434_v24 }
 0x1cd   : > { %v445_v32 = vpop.permute.xlu1 %444 }
 0x1ce   : > { %690 = vmatmul.msk.f32.vlgmr.msra.gmra.mxu1 %vm448_vm6, %v445_v32 }
 0x1d5   : > { %v442_v39 = vpop.permute.xlu1 %441 }
 0x1d6   : > { %691 = vmatmul.msk.f32.gmra.mxu1 %vm448_vm6, %v447_v33 }
 0x24b   : > { %v470_v36 = vpop.f32.mrf.mxu1 }
 0x24c   : > { %v471_v37 = vadd.f32 %v470_v36, %v438_v35 }
 0x24e   : > { %v478_v38 = vmul.f32 1.442695, %v471_v37  ;;  %vm476_vm7 = vcmp.gt.f32.partialorder %v471_v37, 0.0 }
 0x250   : > { %784 = vpow2.f32 %v478_v38 }
 0x253   : > { %v473_v40 = vpop.f32.mrf.mxu1 }
 0x254   : > { %v474_v41 = vadd.f32 %v473_v40, %v442_v39 }
 0x256   : > { %v785_v42 = vpop.eup %784  ;;  %v480_v2 = vmul.f32 1.442695, %v474_v41  ;;  %vm477_vm8 = vcmp.gt.f32.partialorder %v474_v41, 0.0 }
 0x257   : > { %v692_v43 = vadd.f32 -1.0, %v785_v42 }
 0x258   : > { %786 = vpow2.f32 %v480_v2 }
 0x259   : > { %v484_v45 = vsel %vm476_vm7, %v471_v37, %v692_v43 }
 0x25a   : > { %494 = vrot.lane.b32.xlu0 %v484_v45, %s862_s17  ;;  %488 = vrot.lane.b32.xlu1 %v484_v45, %s859_s14  ;;  %v508_v46 = vmul.f32 %v484_v45, %v238_v44 }
 0x25c   : > { %694 = vmatmul.msk.f32.vlgmr.msra.gmra.mxu2 %vm448_vm6, %v508_v46 }
 0x25e   : > { %v787_v47 = vpop.eup %786 }
 0x25f   : > { %v693_v48 = vadd.f32 -1.0, %v787_v47 }
 0x261   : > { %v485_v50 = vsel %vm477_vm8, %v474_v41, %v693_v48 }
 0x262   : > { %496 = vrot.lane.b32.xlu1 %v485_v50, %s862_s17  ;;  %490 = vrot.lane.b32.xlu2 %v485_v50, %s859_s14  ;;  %v509_v51 = vmul.f32 %v485_v50, %v239_v49  ;;  %s218_s17 = scalar_lea.vmem [#allocation2], %s682_s26 }
 0x263   : > { %s591_s14 = sshll.u32 %s218_s17, 4  ;;  %s592_s14 = int_to_ptr.vmem [resolvable:$true] %s591_s14 }
 0x264   : > { %695 = vmatmul.msk.f32.gmra.mxu2 %vm448_vm6, %v509_v51 }
 0x2bc   : > { %v491_v58 = vpop.permute.xlu2 %490 }
 0x2cc   : > { %v495_v53 = vpop.permute.xlu0 %494  ;;  %v489_v54 = vpop.permute.xlu1 %488 }
 0x2cd   : > { %v500_v55 = vsel %vm308_vm3, %v489_v54, %v495_v53 }
 0x2ce   : > { %v502_v56 = vadd.f32 %v500_v55, %v484_v45 }
 0x2d0   : > { %v504_v57 = vmul.f32 0.5, %v502_v56 }
 0x2d2   : > { %506 = vst.msk [vmem:[%s218_s17] sm:$0xff] %vm448_vm6, %v504_v57 }
 0x2d4   : > { %v497_v59 = vpop.permute.xlu1 %496 }
 0x2d5   : > { %v501_v60 = vsel %vm308_vm3, %v491_v58, %v497_v59 }
 0x2d6   : > { %v503_v61 = vadd.f32 %v501_v60, %v485_v50 }
 0x2d8   : > { %v505_v62 = vmul.f32 0.5, %v503_v61 }
 0x2da   : > { %507 = vst.msk [vmem:[%s218_s17 + $0x8] sm:$0xff] %vm448_vm6, %v505_v62 }
 0x2db   : > { %819 = shalt.err (!%p816_p3)
}
 0x2dc   : > { %s870_s25 = smov 128   ;;  %s871_s30 = smov 8   ;;  %vm573_vm12 = vcmask 0  }
 0x2dd   : > { %707 = dma.vmem_to_hbm [thread:$0]  (%p940_p5), %s592_s14, 256, %s594_s10, %s576_s22, %s870_s25, %s870_s25, %s871_s30  }
 0x2de   : > { %s231_s8 = scalar_lea.vmem %s1098_s5, %s957_s7 }
 0x2df   : > { %v535_v63 = vpop.f32.mrf.mxu2 }
 0x2e0   : > { %v541_v3 = vsel %vm290_vm2, %v535_v63, 0.0 }
 0x2e7   : > { %v538_v1 = vpop.f32.mrf.mxu2 }
 0x2e8   : > { %v542_v4 = vsel %vm290_vm2, %v538_v1, 0.0 }
 0x2e9   : > { %v543_v5 = vadd.f32 %v542_v4, %v541_v3 }
 0x2eb   : > { %v544_v6 = vrot.slane %v543_v5, 4 }
 0x2ed   : > { %v545_v7 = vadd.f32 %v544_v6, %v543_v5 }
 0x2ef   : > { %v546_v8 = vrot.slane %v545_v7, 2 }
 0x2f1   : > { %v547_v9 = vadd.f32 %v546_v8, %v545_v7 }
 0x2f3   : > { %v548_v10 = vrot.slane %v547_v9, 1 }
 0x2f5   : > { %v549_v11 = vadd.f32 %v548_v10, %v547_v9 }
 0x2f7   : > { %v553_v12 = vadd.f32 %v551_v52, %v549_v11 }
 0x2f9   : > { %v554_v13 = vsub.f32 0.0, %v553_v12 }
 0x2fb   : > { %v555_v14 = vmul.f32 1.442695, %v554_v13 }
 0x2fd   : > { %788 = vpow2.f32 %v555_v14 }
 0x303   : > { %v789_v15 = vpop.eup %788 }
 0x304   : > { %v557_v16 = vadd.f32 1.0, %v789_v15 }
 0x306   : > { %790 = vrcp.f32 %v557_v16  ;;  %v569_v20 = vand.u32 2147483648, %v557_v16  ;;  %v567_v21 = vand.u32 2147483647, %v557_v16  ;;  %vm563_vm10 = vweird.f32 %v557_v16 }
 0x308   : > { %v570_v23 = vor.u32 1.1754944e-38, %v569_v20  ;;  %vm568_vm13 = vcmp.eq.f32.partialorder %v567_v21, 8.507059e+37 }
 0x30c   : > { %v791_v17 = vpop.eup %790 }
 0x30d   : > { %v559_v18 = vmul.f32 %v791_v17, %v557_v16  ;;  %vm564_vm9 = vweird.f32 %v791_v17 }
 0x30e   : > { %vm565_vm11 = vmor %vm563_vm10, %vm564_vm9 }
 0x30f   : > { %v560_v19 = vsub.f32 1.0, %v559_v18 }
 0x311   : > { %v561_v0 = vmul.f32 %v791_v17, %v560_v19 }
 0x313   : > { %v562_v22 = vadd.f32 %v791_v17, %v561_v0 }
 0x315   : > { %v566_v25 = vsel %vm565_vm11, %v791_v17, %v562_v22 }
 0x316   : > { %v571_v26 = vsel %vm568_vm13, %v570_v23, %v566_v25 }
 0x317   : > { %574 = vst.msk [vmem:[%s231_s8] sm:$0x1] %vm573_vm12, %v571_v26 }
 0x318 PF: > { %p713_p4 = scmp.ge.s32.totalorder %s854_s21, 2  ;;  %s611_s9 = sand.u32 1, %s842_s18  }
 0x319   : > { %s612_s17 = scalar_lea.sflag [#allocation3], %s611_s9 }
 0x31a   : > { %p710_p5 = pnand %p713_p4, %p944_p6 }
 0x31c   : > { %p711_p7 = pneg %p710_p5 }
 0x31e   : > { %837 = dma.done.wait (%p711_p7), %s612_s17, 256  }
 0x31f   : > { %839 = vsyncadd (%p711_p7), %s612_s17, 4294967040  ;;  %p16_p8 = scmp.ge.s32.totalorder %s927_s24, 4   ;;  %s1101_s18 = smov %s846_s19 }
 0x320   : > { %s1102_s19 = smov %s850_s20  ;;  %s1103_s20 = smov %s938_s27 }
 0x321   : > { %s1104_s21 = smov %s927_s24  ;;  %18 = sbr.rel (!%p16_p8) target bundleno = 3 (0x3), region = 83 }
 0x326   :  { %624 = vsyncpa [#allocation3], 1 }
 0x327   :  { %626 = vsyncpa [#allocation3 + $0x1], 1 }

</bundles_post_ra>
